<compile_context>
chip_gen: v5e
topology: v5e:2x2
jax: 0.10.0
libtpu: 0.0.40
codegen_flags: <defaults>
</compile_context>

<pallas_src>
import functools

import jax
import jax.numpy as jnp
from jax.experimental import pallas as pl
from jax.experimental.pallas import tpu as pltpu


def _round_up(x, m):
    return ((x + m - 1) // m) * m


def _confidence_ce_kernel(weak_ref, strong_ref, counts_ref, nll_ref, *,
                          threshold, batch_size, block_batch, class_axis):
    """Accumulate per-class confident counts and masked NLL for one tile."""
    i = pl.program_id(1)

    @pl.when(i == 0)
    def _init():
        counts_ref[...] = jnp.zeros_like(counts_ref)
        nll_ref[...] = jnp.zeros_like(nll_ref)

    batch_axis = 1 - class_axis
    flat_block = pl.program_id(0) * pl.num_programs(1) + i

    weak = weak_ref[...].astype(jnp.float32)
    strong = strong_ref[...].astype(jnp.float32)
    c = weak.shape[class_axis]
    tb = weak.shape[batch_axis]
    samp_shape = (tb, 1) if batch_axis == 0 else (1, tb)

    # Per-sample validity: batch index < true batch size.  This masks both
    # the padded tail of the last real tile and whole duplicate tiles coming
    # from the clamped index_map of an over-provisioned (parallel) grid.
    samp_ids = (flat_block * block_batch
                + jax.lax.broadcasted_iota(jnp.int32, samp_shape, batch_axis))
    valid = samp_ids < batch_size

    # ---- softmax(weak): max prob + first-occurrence argmax (== torch.max) --
    wmax = jnp.max(weak, axis=class_axis, keepdims=True)
    wsum = jnp.sum(jnp.exp(weak - wmax), axis=class_axis, keepdims=True)
    max_prob = 1.0 / wsum          # exact divide: feeds the threshold compare

    iota_c = jax.lax.broadcasted_iota(jnp.int32, weak.shape, class_axis)
    target = jnp.min(jnp.where(weak == wmax, iota_c, c),
                     axis=class_axis, keepdims=True)

    conf = (max_prob > threshold) & valid          # per-sample confidence
    sel = (iota_c == target) & conf                # masked one-hot (bool)

    # ---- per-class confident-sample counts --------------------------------
    # (If a bundle dump ever shows the batch-axis reduces binding on XLU/VALU
    #  these two sums can be routed through the idle MXU as a ones-matmul
    #  with preferred_element_type=f32.)
    counts_ref[...] += jnp.sum(sel.astype(jnp.float32),
                               axis=batch_axis, keepdims=True)[None]

    # ---- per-class masked NLL from log_softmax(strong) ---------------------
    # jnp.where (a select) keeps unspecified padded-row data (possibly
    # NaN/Inf) out of the accumulators without full-tile input zeroing.
    smax = jnp.max(strong, axis=class_axis, keepdims=True)
    sshift = strong - smax
    lse = jnp.log(jnp.sum(jnp.exp(sshift), axis=class_axis, keepdims=True))
    nll_ref[...] += jnp.sum(jnp.where(sel, lse - sshift, 0.0),
                            axis=batch_axis, keepdims=True)[None]


def confidence_based_ce_scan(anchors_weak, anchors_strong, *, threshold,
                             apply_class_balancing,
                             block_batch=None, num_parallel=None,
                             classes_on_sublanes=None, input_buffers=2):
    """Returns (loss, n) like ConfidenceBasedCE_scan.forward.

    `neighbors`, `eta`, `epoch`, `ct1`, `ct2` are unused by the PyTorch
    forward pass and therefore omitted.  Inputs are consumed in their native
    dtype (pass bf16 straight in; the kernel upcasts in-register).
    """
    b, c = anchors_weak.shape
    assert anchors_strong.shape == (b, c), (anchors_weak.shape,
                                            anchors_strong.shape)

    isz_w = jnp.dtype(anchors_weak.dtype).itemsize
    isz_s = jnp.dtype(anchors_strong.dtype).itemsize
    sub_w = max(8, 32 // isz_w)            # dtype sublane packing (8/16/32)
    sub_s = max(8, 32 // isz_s)

    # Lane-occupancy fix: with C < 128 classes on the lane axis only C/128 of
    # every vreg / VMEM tile would carry data (16x waste at C=8), so present
    # the tensors as (C, B): batch on lanes (dense), classes on sublanes.
    # The wrapper-side transpose costs one extra HBM pass per input; pass
    # classes_on_sublanes=False to opt out (e.g. C only slightly below 128).
    if classes_on_sublanes is None:
        classes_on_sublanes = c < 128
    transposed = bool(classes_on_sublanes)

    try:
        vmem_cap = int(pltpu.get_tpu_info().vmem_capacity_bytes)
    except Exception:
        vmem_cap = 64 << 20                # safe per-core floor (v7x)
    vmem_cap = int(min(max(vmem_cap, 32 << 20), 128 << 20))

    # Padding-aware per-sample footprint: native input tiles plus ~3 f32
    # working tiles the kernel materializes per step.
    if transposed:
        granule = 128                      # batch lives on the lane axis
        in_per_samp = _round_up(c, sub_w) * isz_w + _round_up(c, sub_s) * isz_s
        f32_per_samp = 3 * _round_up(c, 8) * 4
    else:
        granule = max(sub_w, sub_s)        # batch lives on the sublane axis
        c_lane = _round_up(c, 128)
        in_per_samp = c_lane * (isz_w + isz_s)
        f32_per_samp = 3 * c_lane * 4

    if block_batch is None:
        budget = vmem_cap // 10            # one live tile (inputs + temps)
        block_batch = budget // max(1, in_per_samp + f32_per_samp)
    block_batch = int(block_batch)
    if block_batch < b:
        block_batch = max(granule, (block_batch // granule) * granule)
    if block_batch >= b:
        block_batch = b

    num_blocks = int(pl.cdiv(b, block_batch))

    # Megacore split (v7x: 2 TensorCores).  Harmless sequential split on
    # 1-TC chips.  Over-provisioned (p, i) pairs are clamped to the last real
    # block by the index_map and fully masked inside the kernel.
    if num_parallel is None:
        num_parallel = 2 if num_blocks >= 2 else 1
    num_parallel = max(1, min(int(num_parallel), num_blocks))
    blocks_per_core = int(pl.cdiv(num_blocks, num_parallel))

    # Actual padded VMEM footprint of one tile pair, for the scoped limit.
    if transposed:
        lanes = _round_up(block_batch, 128)
        in_tile = (_round_up(c, sub_w) * isz_w
                   + _round_up(c, sub_s) * isz_s) * lanes
        f32_tile = 3 * _round_up(c, 8) * 4 * lanes
    else:
        c_lane = _round_up(c, 128)
        in_tile = c_lane * (_round_up(block_batch, sub_w) * isz_w
                            + _round_up(block_batch, sub_s) * isz_s)
        f32_tile = 3 * c_lane * _round_up(block_batch, 8) * 4
    needed = 2 * in_tile + f32_tile + (2 << 20)        # double-buffered inputs
    vmem_limit = int(min(max(needed + (6 << 20), 24 << 20), vmem_cap * 7 // 8))

    if transposed:
        weak_in = jnp.transpose(anchors_weak)          # (C, B)
        strong_in = jnp.transpose(anchors_strong)
        in_block = (c, block_batch)
        out_block = (1, c, 1)
        part_shape = (num_parallel, c, 1)

        def in_map(p, i):
            blk = jnp.minimum(p * blocks_per_core + i, num_blocks - 1)
            return (0, blk)
    else:
        weak_in = anchors_weak                         # (B, C)
        strong_in = anchors_strong
        in_block = (block_batch, c)
        out_block = (1, 1, c)
        part_shape = (num_parallel, 1, c)

        def in_map(p, i):
            blk = jnp.minimum(p * blocks_per_core + i, num_blocks - 1)
            return (blk, 0)

    def out_map(p, i):
        return (p, 0, 0)

    in_spec_kwargs = {}
    if int(input_buffers) != 2:
        # Deeper input pipelining (e.g. 3 on HBM-slow v5e if DMA is exposed).
        in_spec_kwargs["pipeline_mode"] = pl.Buffered(int(input_buffers))
    in_specs = [pl.BlockSpec(in_block, in_map, **in_spec_kwargs),
                pl.BlockSpec(in_block, in_map, **in_spec_kwargs)]
    out_specs = (pl.BlockSpec(out_block, out_map),
                 pl.BlockSpec(out_block, out_map))

    kernel = functools.partial(
        _confidence_ce_kernel,
        threshold=float(threshold),
        batch_size=b,
        block_batch=block_batch,
        class_axis=0 if transposed else 1)

    bytes_accessed = b * c * (isz_w + isz_s) * (3 if transposed else 1)
    counts_parts, nll_parts = pl.pallas_call(
        kernel,
        out_shape=(jax.ShapeDtypeStruct(part_shape, jnp.float32),
                   jax.ShapeDtypeStruct(part_shape, jnp.float32)),
        grid=(num_parallel, blocks_per_core),
        in_specs=in_specs,
        out_specs=out_specs,
        compiler_params=pltpu.CompilerParams(
            dimension_semantics=("parallel", "arbitrary"),
            vmem_limit_bytes=vmem_limit),
        cost_estimate=pl.CostEstimate(
            flops=12 * b * c,
            transcendentals=2 * b * c,
            bytes_accessed=bytes_accessed),
    )(weak_in, strong_in)

    # O(C) finalize in plain JAX: class-balancing weights and the weighted
    # 'mean' reduction of F.cross_entropy over the confident samples:
    #     loss = sum_i w[t_i] * nll_i / sum_i w[t_i]
    counts = jnp.sum(counts_parts, axis=0).reshape(c)        # (C,)
    nll = jnp.sum(nll_parts, axis=0).reshape(c)               # (C,)
    n = jnp.sum(counts)
    if apply_class_balancing:
        h = 1.02
        weight = jnp.where(counts > 0.0, 1.0 / jnp.log(h + counts / n),
                           jnp.ones_like(counts))
    else:
        weight = jnp.ones_like(counts)
    # TODO(synk): PyTorch raises ValueError when the confidence mask is all
    # zeros; here the denominator is 0 and the loss is NaN (with n == 0).
    loss = jnp.sum(weight * nll) / jnp.sum(weight * counts)
    return loss, n.astype(jnp.int32)


def _reference(anchors_weak, anchors_strong, threshold, apply_class_balancing):
    """Pure-JAX reference mirroring the PyTorch semantics."""
    weak = anchors_weak.astype(jnp.float32)
    strong = anchors_strong.astype(jnp.float32)
    prob = jax.nn.softmax(weak, axis=1)
    max_prob = jnp.max(prob, axis=1)
    target = jnp.argmax(prob, axis=1)
    maskf = (max_prob > threshold).astype(jnp.float32)
    b, c = prob.shape
    onehot = jax.nn.one_hot(target, c, dtype=jnp.float32)
    counts = jnp.sum(onehot * maskf[:, None], axis=0)
    n = jnp.sum(maskf)
    if apply_class_balancing:
        weight = jnp.where(counts > 0, 1.0 / jnp.log(1.02 + counts / n),
                           jnp.ones_like(counts))
    else:
        weight = jnp.ones((c,), jnp.float32)
    logsm = jax.nn.log_softmax(strong, axis=1)
    picked = jnp.sum(onehot * logsm, axis=1)
    w_i = weight[target]
    loss = jnp.sum(maskf * w_i * (-picked)) / jnp.sum(maskf * w_i)
    return loss, n.astype(jnp.int32)


def _make_logits(key, b, c, margin):
    """Random logits with a planted margin so a healthy fraction of samples
    clears the confidence threshold (keeps the tests away from the n == 0
    NaN corner while still exercising both mask states)."""
    kn, kc = jax.random.split(key)
    noise = jax.random.normal(kn, (b, c), dtype=jnp.float32)
    cls = jax.random.randint(kc, (b,), 0, c)
    return noise + margin * jax.nn.one_hot(cls, c, dtype=jnp.float32)


if __name__ == "__main__":
    key = jax.random.PRNGKey(0)
    ks = jax.random.split(key, 8)
    threshold = 0.3

    def check(loss, n, weak, strong, balance, tag, tol=1e-5):
        loss = jax.block_until_ready(loss)
        n = jax.block_until_ready(n)
        ref_loss, ref_n = _reference(weak, strong, threshold, balance)
        assert int(n) == int(ref_n), (tag, int(n), int(ref_n))
        assert jnp.allclose(loss, ref_loss, rtol=tol, atol=tol), (
            tag, float(loss), float(ref_loss))

    # 1) small-C f32, single tile on the class-on-sublanes path.
    w1 = _make_logits(ks[0], 20, 8, margin=2.5)
    s1 = jax.random.normal(ks[1], (20, 8), dtype=jnp.float32)
    loss1, n1 = confidence_based_ce_scan(
        w1, s1, threshold=threshold, apply_class_balancing=True)
    check(loss1, n1, w1, s1, True, "small-C f32")

    # 2) native bf16 inputs (in-kernel upcast), no class balancing.
    w2 = _make_logits(ks[2], 16, 8, margin=2.5).astype(jnp.bfloat16)
    s2 = jax.random.normal(ks[3], (16, 8), jnp.float32).astype(jnp.bfloat16)
    loss2, n2 = confidence_based_ce_scan(
        w2, s2, threshold=threshold, apply_class_balancing=False)
    check(loss2, n2, w2, s2, False, "bf16", tol=1e-4)

    # 3) multi-tile transposed path with a (parallel, arbitrary) grid,
    #    partial last tile and a clamped over-provisioned block.
    w3 = _make_logits(ks[4], 300, 10, margin=2.0)
    s3 = jax.random.normal(ks[5], (300, 10), dtype=jnp.float32)
    loss3, n3 = confidence_based_ce_scan(
        w3, s3, threshold=threshold, apply_class_balancing=True,
        block_batch=128, num_parallel=2)
    check(loss3, n3, w3, s3, True, "multi-tile transposed")

    # 4) class-last path (C == 128 keeps full lane occupancy, no transpose),
    #    multi-tile with parallel partial accumulators.
    w4 = _make_logits(ks[6], 24, 128, margin=6.0)
    s4 = jax.random.normal(ks[7], (24, 128), dtype=jnp.float32)
    loss4, n4 = confidence_based_ce_scan(
        w4, s4, threshold=threshold, apply_class_balancing=True,
        block_batch=8, num_parallel=2)
    check(loss4, n4, w4, s4, True, "class-last")

    print("KERNEL_OK")
</pallas_src>

<mosaic_0001>
module attributes {stable_mosaic.version = 11 : i64} {
  func.func @_confidence_ce_kernel(%arg0: i32, %arg1: i32, %arg2: memref<8x20xf32, #tpu.memory_space<vmem>>, %arg3: memref<8x20xf32, #tpu.memory_space<vmem>>, %arg4: memref<1x8x1xf32, #tpu.memory_space<vmem>>, %arg5: memref<1x8x1xf32, #tpu.memory_space<vmem>>) attributes {dimension_semantics = [#tpu.dimension_semantics<parallel>, #tpu.dimension_semantics<arbitrary>], iteration_bounds = array<i64: 1, 1>, scalar_prefetch = 0 : i64, scratch_operands = 0 : i64, tpu.core_type = #tpu.core_type<tc>, window_params = [{transform_indices = @transform_0, window_bounds = array<i64: 8, 20>}, {transform_indices = @transform_1, window_bounds = array<i64: 8, 20>}, {transform_indices = @transform_2, window_bounds = array<i64: 1, 8, 1>}, {transform_indices = @transform_3, window_bounds = array<i64: 1, 8, 1>}]} {
    %c0_i32 = arith.constant 0 : i32
    %0 = arith.cmpi eq, %arg1, %c0_i32 : i32
    %1 = arith.extui %0 : i1 to i32
    %c0_i32_0 = arith.constant 0 : i32
    %2 = arith.cmpi ne, %1, %c0_i32_0 : i32
    scf.if %2 {
      %cst_26 = arith.constant 0.000000e+00 : f32
      %62 = vector.broadcast %cst_26 : f32 to vector<1x8x1xf32>
      %c0_27 = arith.constant 0 : index
      %c0_28 = arith.constant 0 : index
      %c0_29 = arith.constant 0 : index
      %63 = vector.load %arg4[%c0_27, %c0_28, %c0_29] : memref<1x8x1xf32, #tpu.memory_space<vmem>>, vector<1x8x1xf32>
      tpu.vector_store %arg4[%c0_27, %c0_28, %c0_29], %62 {strides = array<i32>} : memref<1x8x1xf32, #tpu.memory_space<vmem>>, vector<1x8x1xf32>,
      %cst_30 = arith.constant 0.000000e+00 : f32
      %64 = vector.broadcast %cst_30 : f32 to vector<1x8x1xf32>
      %c0_31 = arith.constant 0 : index
      %c0_32 = arith.constant 0 : index
      %c0_33 = arith.constant 0 : index
      %65 = vector.load %arg5[%c0_31, %c0_32, %c0_33] : memref<1x8x1xf32, #tpu.memory_space<vmem>>, vector<1x8x1xf32>
      tpu.vector_store %arg5[%c0_31, %c0_32, %c0_33], %64 {strides = array<i32>} : memref<1x8x1xf32, #tpu.memory_space<vmem>>, vector<1x8x1xf32>,
    } else {
    }
    %c1_i32 = arith.constant 1 : i32
    %3 = arith.muli %arg0, %c1_i32 : i32
    %4 = arith.addi %3, %arg1 : i32
    %c0 = arith.constant 0 : index
    %c0_1 = arith.constant 0 : index
    %5 = vector.load %arg2[%c0, %c0_1] : memref<8x20xf32, #tpu.memory_space<vmem>>, vector<8x20xf32>
    %c0_2 = arith.constant 0 : index
    %c0_3 = arith.constant 0 : index
    %6 = vector.load %arg3[%c0_2, %c0_3] : memref<8x20xf32, #tpu.memory_space<vmem>>, vector<8x20xf32>
    %c20_i32 = arith.constant 20 : i32
    %7 = arith.muli %4, %c20_i32 : i32
    %8 = tpu.iota {dimensions = array<i32: 1>} : vector<1x20xi32>
    %9 = vector.broadcast %7 : i32 to vector<1x20xi32>
    %10 = arith.addi %9, %8 : vector<1x20xi32>
    %c20_i32_4 = arith.constant 20 : i32
    %11 = vector.broadcast %c20_i32_4 : i32 to vector<1x20xi32>
    %12 = arith.cmpi slt, %10, %11 : vector<1x20xi32>
    %cst = arith.constant dense<0xFF800000> : vector<20xf32>
    %13 = vector.multi_reduction <maximumf>, %5, %cst [0] : vector<8x20xf32> to vector<20xf32>
    %14 = vector.shape_cast %13 : vector<20xf32> to vector<1x20xf32>
    %15 = vector.broadcast %14 : vector<1x20xf32> to vector<8x20xf32>
    %16 = arith.subf %5, %15 : vector<8x20xf32>
    %17 = math.exp %16 : vector<8x20xf32>
    %cst_5 = arith.constant dense<0.000000e+00> : vector<20xf32>
    %18 = vector.multi_reduction <add>, %17, %cst_5 [0] : vector<8x20xf32> to vector<20xf32>
    %19 = vector.shape_cast %18 : vector<20xf32> to vector<1x20xf32>
    %cst_6 = arith.constant 1.000000e+00 : f32
    %20 = vector.broadcast %cst_6 : f32 to vector<1x20xf32>
    %21 = arith.divf %20, %19 : vector<1x20xf32>
    %22 = tpu.iota {dimensions = array<i32: 0>} : vector<8x20xi32>
    %23 = vector.broadcast %14 : vector<1x20xf32> to vector<8x20xf32>
    %24 = arith.cmpf oeq, %5, %23 : vector<8x20xf32>
    %c8_i32 = arith.constant 8 : i32
    %25 = vector.broadcast %c8_i32 : i32 to vector<8x20xi32>
    %26 = arith.select %24, %22, %25 : vector<8x20xi1>, vector<8x20xi32>
    %cst_7 = arith.constant dense<2147483647> : vector<20xi32>
    %27 = vector.multi_reduction <minsi>, %26, %cst_7 [0] : vector<8x20xi32> to vector<20xi32>
    %28 = vector.shape_cast %27 : vector<20xi32> to vector<1x20xi32>
    %cst_8 = arith.constant 3.000000e-01 : f32
    %29 = vector.broadcast %cst_8 : f32 to vector<1x20xf32>
    %30 = arith.cmpf ogt, %21, %29 : vector<1x20xf32>
    %31 = arith.andi %30, %12 : vector<1x20xi1>
    %32 = vector.broadcast %28 : vector<1x20xi32> to vector<8x20xi32>
    %33 = arith.cmpi eq, %22, %32 : vector<8x20xi32>
    %34 = vector.broadcast %31 : vector<1x20xi1> to vector<8x20xi1>
    %35 = arith.andi %33, %34 : vector<8x20xi1>
    %c0_9 = arith.constant 0 : index
    %c0_10 = arith.constant 0 : index
    %c0_11 = arith.constant 0 : index
    %36 = vector.load %arg4[%c0_9, %c0_10, %c0_11] : memref<1x8x1xf32, #tpu.memory_space<vmem>>, vector<1x8x1xf32>
    %37 = arith.extui %35 : vector<8x20xi1> to vector<8x20xi32>
    %38 = arith.sitofp %37 : vector<8x20xi32> to vector<8x20xf32>
    %cst_12 = arith.constant dense<0.000000e+00> : vector<8xf32>
    %39 = vector.multi_reduction <add>, %38, %cst_12 [1] : vector<8x20xf32> to vector<8xf32>
    %40 = vector.shape_cast %39 : vector<8xf32> to vector<8x1xf32>
    %41 = vector.shape_cast %40 : vector<8x1xf32> to vector<1x8x1xf32>
    %42 = arith.addf %36, %41 : vector<1x8x1xf32>
    %c0_13 = arith.constant 0 : index
    %c0_14 = arith.constant 0 : index
    %c0_15 = arith.constant 0 : index
    %43 = vector.load %arg4[%c0_13, %c0_14, %c0_15] : memref<1x8x1xf32, #tpu.memory_space<vmem>>, vector<1x8x1xf32>
    tpu.vector_store %arg4[%c0_13, %c0_14, %c0_15], %42 {strides = array<i32>} : memref<1x8x1xf32, #tpu.memory_space<vmem>>, vector<1x8x1xf32>,
    %cst_16 = arith.constant dense<0xFF800000> : vector<20xf32>
    %44 = vector.multi_reduction <maximumf>, %6, %cst_16 [0] : vector<8x20xf32> to vector<20xf32>
    %45 = vector.shape_cast %44 : vector<20xf32> to vector<1x20xf32>
    %46 = vector.broadcast %45 : vector<1x20xf32> to vector<8x20xf32>
    %47 = arith.subf %6, %46 : vector<8x20xf32>
    %48 = math.exp %47 : vector<8x20xf32>
    %cst_17 = arith.constant dense<0.000000e+00> : vector<20xf32>
    %49 = vector.multi_reduction <add>, %48, %cst_17 [0] : vector<8x20xf32> to vector<20xf32>
    %50 = vector.shape_cast %49 : vector<20xf32> to vector<1x20xf32>
    %51 = math.log %50 : vector<1x20xf32>
    %c0_18 = arith.constant 0 : index
    %c0_19 = arith.constant 0 : index
    %c0_20 = arith.constant 0 : index
    %52 = vector.load %arg5[%c0_18, %c0_19, %c0_20] : memref<1x8x1xf32, #tpu.memory_space<vmem>>, vector<1x8x1xf32>
    %53 = vector.broadcast %51 : vector<1x20xf32> to vector<8x20xf32>
    %54 = arith.subf %53, %47 : vector<8x20xf32>
    %cst_21 = arith.constant 0.000000e+00 : f32
    %55 = vector.broadcast %cst_21 : f32 to vector<8x20xf32>
    %56 = arith.select %35, %54, %55 : vector<8x20xi1>, vector<8x20xf32>
    %cst_22 = arith.constant dense<0.000000e+00> : vector<8xf32>
    %57 = vector.multi_reduction <add>, %56, %cst_22 [1] : vector<8x20xf32> to vector<8xf32>
    %58 = vector.shape_cast %57 : vector<8xf32> to vector<8x1xf32>
    %59 = vector.shape_cast %58 : vector<8x1xf32> to vector<1x8x1xf32>
    %60 = arith.addf %52, %59 : vector<1x8x1xf32>
    %c0_23 = arith.constant 0 : index
    %c0_24 = arith.constant 0 : index
    %c0_25 = arith.constant 0 : index
    %61 = vector.load %arg5[%c0_23, %c0_24, %c0_25] : memref<1x8x1xf32, #tpu.memory_space<vmem>>, vector<1x8x1xf32>
    tpu.vector_store %arg5[%c0_23, %c0_24, %c0_25], %60 {strides = array<i32>} : memref<1x8x1xf32, #tpu.memory_space<vmem>>, vector<1x8x1xf32>,
    return
  }
  func.func @transform_0(%arg0: i32, %arg1: i32) -> (i32, i32) {
    %c1_i32 = arith.constant 1 : i32
    %0 = arith.muli %arg0, %c1_i32 : i32
    %1 = arith.addi %0, %arg1 : i32
    %c0_i32 = arith.constant 0 : i32
    %2 = arith.minsi %1, %c0_i32 : i32
    %c0_i32_0 = arith.constant 0 : i32
    %c0_i32_1 = arith.constant 0 : i32
    return %c0_i32_0, %2 : i32, i32
  }
  func.func @transform_1(%arg0: i32, %arg1: i32) -> (i32, i32) {
    %c1_i32 = arith.constant 1 : i32
    %0 = arith.muli %arg0, %c1_i32 : i32
    %1 = arith.addi %0, %arg1 : i32
    %c0_i32 = arith.constant 0 : i32
    %2 = arith.minsi %1, %c0_i32 : i32
    %c0_i32_0 = arith.constant 0 : i32
    %c0_i32_1 = arith.constant 0 : i32
    return %c0_i32_0, %2 : i32, i32
  }
  func.func @transform_2(%arg0: i32, %arg1: i32) -> (i32, i32, i32) {
    %c0_i32 = arith.constant 0 : i32
    %c0_i32_0 = arith.constant 0 : i32
    %c0_i32_1 = arith.constant 0 : i32
    return %arg0, %c0_i32, %c0_i32_0 : i32, i32, i32
  }
  func.func @transform_3(%arg0: i32, %arg1: i32) -> (i32, i32, i32) {
    %c0_i32 = arith.constant 0 : i32
    %c0_i32_0 = arith.constant 0 : i32
    %c0_i32_1 = arith.constant 0 : i32
    return %arg0, %c0_i32, %c0_i32_0 : i32, i32, i32
  }
}

</mosaic_0001>

<bundles_post_ra>
// kernel: tpu_custom_call.1
= control target key start
LH: loop header
LB: loop body
LE: loop exit
PB: predicated region body
PF: predicated region fallthrough
CT: control target
= control target key end

     0   :  { %9 = vsyncpa [#allocation3], 0  ;;  %s301_s0 = inlined_call_operand.hbm [shape: f32[8,20], index: 0, kind: input, shape index: {}]   ;;  %s302_s1 = inlined_call_operand.hbm [shape: f32[8,20], index: 1, kind: input, shape index: {}]   ;;  %s303_s2 = inlined_call_operand.vmem [shape: f32[1,8,1], index: 2, kind: output, shape index: {0}]   ;;  %s304_s3 = inlined_call_operand.vmem [shape: f32[1,8,1], index: 3, kind: output, shape index: {1}]  }
   0x1   :  { %s21_s14 = sshll.u32 %s301_s0, 4  ;;  %s22_s14 = int_to_ptr.hbm [resolvable:$true] %s21_s14 }
   0x2   :  { %10 = vsyncpa [#allocation5], 0  ;;  %s240_s15 = smov [#allocation2]   ;;  %s37_s19 = sshll.u32 %s302_s1, 4  ;;  %s38_s19 = int_to_ptr.hbm [resolvable:$true] %s37_s19 }
   0x3   :  { %s23_s16 = sshll.u32 %s240_s15, 4  ;;  %s241_s20 = smov [#allocation4]   ;;  %s24_s16 = int_to_ptr.vmem [resolvable:$true] %s23_s16 }
   0x4   :  { %26 = dma.hbm_to_vmem [thread:$0]  %s22_s14, 128, %s24_s16, [#allocation3]  }
   0x5   :  { %s39_s21 = sshll.u32 %s241_s20, 4  ;;  %s40_s21 = int_to_ptr.vmem [resolvable:$true] %s39_s21 }
   0x6   :  { %42 = dma.hbm_to_vmem [thread:$0]  %s38_s19, 128, %s40_s21, [#allocation5]  }
   0x7   :  { %236 = dma.done.wait [#allocation3], 128  }
   0x8   :  { %237 = vsyncadd [#allocation3], 4294967168 }
   0x9   :  { %238 = dma.done.wait [#allocation5], 128  }
   0xa   :  { %239 = vsyncadd [#allocation5], 4294967168  ;;  %vm61_vm0 = vcmask 7168   ;;  %v242_v0 = vmov 0.0   ;;  %vm73_vm1 = vcmask 162816   ;;  %v65_v1 = vld [vmem:[#allocation2] sm:$0xff]  ;;  %v68_v13 = vlaneseq }
   0xb   :  { %62 = vst.msk [vmem:[%s303_s2] sm:$0xff] %vm61_vm0, %v242_v0  ;;  %v66_v2 = vld [vmem:[#allocation4] sm:$0xff]  ;;  %v74_v3 = vsel %vm73_vm1, %v65_v1, -inf }
   0xc   :  { %63 = vst.msk [vmem:[%s304_s3] sm:$0xff] %vm61_vm0, %v242_v0  ;;  %v135_v4 = vsel %vm73_vm1, %v66_v2, -inf  ;;  %v75_v5 = vrot.slane %v74_v3, 4  ;;  %v107_v19 = vshrl.u32 %v68_v13, 7  ;;  %v69_v51 = vand.u32 127, %v68_v13 }
   0xd   :  { %v136_v6 = vrot.slane %v135_v4, 4 }
   0xe   :  { %v76_v7 = vmax.f32 %v74_v3, %v75_v5  ;;  %vm72_vm10 = vcmp.lt.s32.totalorder %v69_v51, 20 }
   0xf   :  { %v137_v8 = vmax.f32 %v135_v4, %v136_v6 }
  0x10   :  { %v77_v9 = vrot.slane %v76_v7, 2 }
  0x11   :  { %v138_v10 = vrot.slane %v137_v8, 2 }
  0x12   :  { %v78_v11 = vmax.f32 %v76_v7, %v77_v9 }
  0x13   :  { %v139_v12 = vmax.f32 %v137_v8, %v138_v10 }
  0x14   :  { %v79_v14 = vrot.slane %v78_v11, 1 }
  0x15   :  { %v140_v15 = vrot.slane %v139_v12, 1 }
  0x16   :  { %v80_v16 = vmax.f32 %v78_v11, %v79_v14 }
  0x17   :  { %v141_v17 = vmax.f32 %v139_v12, %v140_v15 }
  0x18   :  { %v81_v18 = vsub.f32 %v65_v1, %v80_v16  ;;  %vm108_vm2 = vcmp.eq.f32.partialorder %v65_v1, %v80_v16 }
  0x19   :  { %v142_v20 = vsub.f32 %v66_v2, %v141_v17  ;;  %v109_v23 = vsel %vm108_vm2, %v107_v19, 8  ;;  %v126_v2 = vld [vmem:[%s303_s2] sm:$0xff] }
  0x1a   :  { %v82_v21 = vmul.f32 1.442695, %v81_v18  ;;  %v110_v24 = vsel %vm73_vm1, %v109_v23, 2147483647 }
  0x1b   :  { %v143_v22 = vmul.f32 1.442695, %v142_v20  ;;  %v111_v26 = vrot.slane %v110_v24, 4 }
  0x1c   :  { %180 = vpow2.f32 %v82_v21 }
  0x1d   :  { %182 = vpow2.f32 %v143_v22  ;;  %vm112_vm3 = vcmp.lt.s32.totalorder %v110_v24, %v111_v26 }
  0x1e   :  { %v113_v35 = vsel %vm112_vm3, %v110_v24, %v111_v26 }
  0x1f   :  { %v114_v40 = vrot.slane %v113_v35, 2 }
  0x21   :  { %vm115_vm4 = vcmp.lt.s32.totalorder %v113_v35, %v114_v40 }
  0x22   :  { %v181_v25 = vpop.eup %180  ;;  %v116_v43 = vsel %vm115_vm4, %v113_v35, %v114_v40 }
  0x23   :  { %v183_v27 = vpop.eup %182  ;;  %v84_v28 = vsel %vm73_vm1, %v181_v25, 0.0  ;;  %v117_v46 = vrot.slane %v116_v43, 1 }
  0x24   :  { %v85_v29 = vrot.slane %v84_v28, 4  ;;  %v145_v30 = vsel %vm73_vm1, %v183_v27, 0.0 }
  0x25   :  { %v146_v31 = vrot.slane %v145_v30, 4  ;;  %vm118_vm7 = vcmp.lt.s32.totalorder %v116_v43, %v117_v46 }
  0x26   :  { %v86_v32 = vadd.f32 %v85_v29, %v84_v28  ;;  %v119_v56 = vsel %vm118_vm7, %v116_v43, %v117_v46 }
  0x27   :  { %v147_v33 = vadd.f32 %v146_v31, %v145_v30  ;;  %vm122_vm11 = vcmp.eq.s32.totalorder %v107_v19, %v119_v56 }
  0x28   :  { %v87_v34 = vrot.slane %v86_v32, 2 }
  0x29   :  { %v148_v36 = vrot.slane %v147_v33, 2 }
  0x2a   :  { %v88_v37 = vadd.f32 %v87_v34, %v86_v32 }
  0x2b   :  { %v149_v38 = vadd.f32 %v148_v36, %v147_v33 }
  0x2c   :  { %v89_v39 = vrot.slane %v88_v37, 1 }
  0x2d   :  { %v150_v42 = vrot.slane %v149_v38, 1 }
  0x2e   :  { %v90_v41 = vadd.f32 %v89_v39, %v88_v37 }
  0x2f   :  { %v151_v44 = vadd.f32 %v150_v42, %v149_v38 }
  0x30   :  { %184 = vrcp.f32 %v90_v41  ;;  %v102_v48 = vand.u32 2147483648, %v90_v41  ;;  %vm96_vm5 = vweird.f32 %v90_v41  ;;  %v100_v50 = vand.u32 2147483647, %v90_v41 }
  0x31   :  { %186 = vlog2.f32 %v151_v44 }
  0x32   :  { %v103_v53 = vor.u32 1.1754944e-38, %v102_v48  ;;  %vm101_vm9 = vcmp.eq.f32.partialorder %v100_v50, 8.507059e+37 }
  0x36   :  { %v185_v45 = vpop.eup %184 }
  0x37   :  { %v92_v47 = vmul.f32 %v185_v45, %v90_v41  ;;  %vm97_vm6 = vweird.f32 %v185_v45  ;;  %v187_v54 = vpop.eup %186 }
  0x38   :  { %vm98_vm8 = vmor %vm96_vm5, %vm97_vm6  ;;  %v153_v59 = vmul.f32 0.6931472, %v187_v54 }
  0x39   :  { %v93_v49 = vsub.f32 1.0, %v92_v47 }
  0x3a   :  { %v155_v61 = vsub.f32 %v153_v59, %v142_v20 }
  0x3b   :  { %v94_v52 = vmul.f32 %v185_v45, %v93_v49 }
  0x3d   :  { %v95_v55 = vadd.f32 %v185_v45, %v94_v52 }
  0x3f   :  { %v99_v57 = vsel %vm98_vm8, %v185_v45, %v95_v55 }
  0x40   :  { %v104_v58 = vsel %vm101_vm9, %v103_v53, %v99_v57 }
  0x41   :  { %vm120_vm12 = vcmp.gt.f32.partialorder %v104_v58, 0.3 }
  0x42   :  { %vm121_vm13 = vmand %vm120_vm12, %vm72_vm10 }
  0x43   :  { %vm125_vm14 = vmand %vm122_vm11, %vm121_vm13 }
  0x44   :  { %v176_v60 = vsel %vm125_vm14, 1.0, %v242_v0  ;;  %v156_v63 = vsel %vm125_vm14, %v155_v61, 0.0  ;;  %v154_v0 = vld [vmem:[%s304_s3] sm:$0xff] }
  0x45   :  { %v129_v62 = vsel %vm73_vm1, %v176_v60, 0.0  ;;  %v157_v1 = vsel %vm73_vm1, %v156_v63, 0.0 }
  0x46   :  { %130 = vadd.xlane.f32.xlu0 %v129_v62 }
  0x4e   :  { %158 = vadd.xlane.f32.xlu0 %v157_v1 }
  0xb9   :  { %v131_v3 = vpop.xlane.xlu0 %130 }
  0xba   :  { %v132_v4 = vadd.f32 %v131_v3, %v126_v2 }
  0xbc   :  { %134 = vst.msk [vmem:[%s303_s2] sm:$0xff] %vm61_vm0, %v132_v4 }
  0xc1   :  { %v159_v5 = vpop.xlane.xlu0 %158 }
  0xc2   :  { %v160_v6 = vadd.f32 %v159_v5, %v154_v0 }
  0xc4   :  { %161 = vst.msk [vmem:[%s304_s3] sm:$0xff] %vm61_vm0, %v160_v6 }
  0xc5   :  { %170 = vsyncpa [#allocation3], 1 }
  0xc6   :  { %171 = vsyncpa [#allocation5], 1 }

</bundles_post_ra>
